<compile_context>
chip_gen: v6e
topology: v6e:2x2x1
jax: 0.10.0
libtpu: 0.0.40
codegen_flags: <defaults>
</compile_context>

<pallas_src>
import functools

import jax
import jax.numpy as jnp
from jax import lax
from jax.experimental import pallas as pl
from jax.experimental.pallas import tpu as pltpu


_CHUNK = 2048  # rows per in-kernel strip (multiple of 8 sublanes)

# VMEM bytes per batch row: the [tb, D], [tb, 1] and [tb, 1] blocks each pad
# their minor dim to 128 lanes (512 B/row in f32) and each is double-buffered.
_VMEM_BYTES_PER_ROW = 3 * 2 * 128 * 4  # = 3072


def _weightnet_kernel(x_ref, r_ref, wx_ref, s_ref, o_ref):
    # x_ref : [tb, D] native dtype (samples on sublanes, features on lanes)
    # r_ref : [tb, 1] native dtype (observed-reward column)
    # wx_ref: [1, D]  f32, x-weights pre-scaled by 1/5 (resident tiny block)
    # s_ref : (2,)    f32 in SMEM: [w_obs/5, bias/5]
    # o_ref : [tb, 1] f32
    wx = wx_ref[...]          # [1, D], loaded once per block
    w_r = s_ref[0]
    b = s_ref[1]
    tb = x_ref.shape[0]

    def compute(start, rows):
        xs = x_ref[pl.ds(start, rows), :].astype(jnp.float32)            # VPU cast
        acc = jnp.sum(xs * wx, axis=1, keepdims=True)                    # VPU mul + XLU lane-reduce
        acc = acc + r_ref[pl.ds(start, rows), :].astype(jnp.float32) * w_r
        o_ref[pl.ds(start, rows), :] = jnp.exp(acc + b)                  # EUP

    n_full, rem = divmod(tb, _CHUNK)
    if n_full > 0:
        def body(c, carry):
            compute(pl.multiple_of(c * _CHUNK, _CHUNK), _CHUNK)
            return carry
        lax.fori_loop(0, n_full, body, 0)
    if rem > 0:
        compute(n_full * _CHUNK, rem)


def _detect_vmem_bytes():
    try:
        cap = int(pltpu.get_tpu_info().vmem_capacity_bytes)
        if cap > 0:
            return cap
    except Exception:
        pass
    return 64 << 20  # conservative fallback: v7x per-TensorCore VMEM


def _tile_plan(B, block_b):
    """Pick (batch tile rows, vmem_limit_bytes) from the detected VMEM size."""
    vmem = _detect_vmem_bytes()
    if block_b is None:
        budget = (vmem * 3) // 4 - (4 << 20)            # leave headroom
        tb = budget // _VMEM_BYTES_PER_ROW
        tb = max(_CHUNK, min(tb, 1 << 16))
        tb = (tb // _CHUNK) * _CHUNK                    # whole in-kernel strips
    else:
        tb = max(8, (int(block_b) // 8) * 8)            # sublane-aligned
    if tb >= B:
        tb = B                                          # single full-dim block
    need = tb * _VMEM_BYTES_PER_ROW + (6 << 20)
    vmem_limit = int(min(max(need, 32 << 20), vmem - (4 << 20)))
    return tb, vmem_limit


@functools.partial(jax.jit, static_argnames=("tb", "vmem_limit"))
def _forward(x, obs_rew, weight, bias, tb, vmem_limit):
    B, D = x.shape
    F = D + 1

    # Fold the /5 into the (tiny) parameters (PyTorch Linear weight is [1, F]).
    wx = (weight[:, :D] / 5.0).astype(jnp.float32)                            # [1, D]
    scal = (jnp.concatenate([weight[:, D], bias]) / 5.0).astype(jnp.float32)  # (2,)

    grid_b = pl.cdiv(B, tb)
    bytes_accessed = (B * D * x.dtype.itemsize
                      + B * obs_rew.dtype.itemsize
                      + B * 4)

    out = pl.pallas_call(
        _weightnet_kernel,
        out_shape=jax.ShapeDtypeStruct((B, 1), jnp.float32),
        grid=(grid_b,),
        in_specs=[
            pl.BlockSpec((tb, D), lambda i: (i, 0)),            # x tile (streamed)
            pl.BlockSpec((tb, 1), lambda i: (i, 0)),            # obs_rew tile
            pl.BlockSpec((1, D), lambda i: (0, 0)),             # x-weights, VMEM-resident
            pl.BlockSpec(memory_space=pltpu.MemorySpace.SMEM),  # [w_obs/5, bias/5]
        ],
        out_specs=pl.BlockSpec((tb, 1), lambda i: (i, 0)),
        compiler_params=pltpu.CompilerParams(
            # TODO(synk): if xprof shows one v7x TensorCore idle, switch to
            # (pltpu.CORE_PARALLEL,) or an explicit core_map split.
            dimension_semantics=("parallel",),
            vmem_limit_bytes=vmem_limit,
        ),
        cost_estimate=pl.CostEstimate(
            flops=2 * B * F,
            transcendentals=B,
            bytes_accessed=bytes_accessed,
        ),
    )(x, obs_rew, wx, scal)
    return out


def weight_network_forward(x, obs_rew, weight, bias, *, block_b=None):
    """Forward pass of WeightNetwork: exp(Linear(cat(x, obs_rew)) / 5).

    x:       [B, D]    activations
    obs_rew: [B, 1]    observed reward column
    weight:  [1, D+1]  nn.Linear weight (PyTorch layout)
    bias:    [1]       nn.Linear bias
    returns  [B, 1]    float32
    """
    B = x.shape[0]
    tb, vmem_limit = _tile_plan(B, block_b)
    return _forward(x, obs_rew, weight, bias, tb, vmem_limit)


if __name__ == "__main__":
    key = jax.random.PRNGKey(0)
    k_x, k_r, k_w, k_b, k_x2, k_r2, k_x3, k_r3 = jax.random.split(key, 8)

    B = 8
    data_dim = 7          # -> Linear(in_features=8, out_features=1)
    fan_in = data_dim + 1

    # Deterministic params (PyTorch Linear default: U(-k, k), k = 1/sqrt(fan_in)).
    bound = 1.0 / (fan_in ** 0.5)
    weight = jax.random.uniform(k_w, (1, fan_in), minval=-bound, maxval=bound,
                                dtype=jnp.float32)
    bias = jax.random.uniform(k_b, (1,), minval=-bound, maxval=bound,
                              dtype=jnp.float32)

    def ref_forward(xx, rr):
        inp = jnp.concatenate((xx, rr), axis=1)
        return jnp.exp((inp @ weight.T + bias) / 5.0)

    # 1) Small demo shape (single full-array block, auto tile plan).
    x = jax.random.normal(k_x, (B, data_dim), dtype=jnp.float32)
    obs_rew = jax.random.normal(k_r, (B, 1), dtype=jnp.float32)
    out = jax.block_until_ready(weight_network_forward(x, obs_rew, weight, bias))
    assert out.shape == (B, 1)
    assert jnp.allclose(out, ref_forward(x, obs_rew), rtol=1e-5, atol=1e-6)

    # 2) Multi-block + ragged tail (grid=3, last block clipped -- no jnp.pad).
    B2 = 300
    x2 = jax.random.normal(k_x2, (B2, data_dim), dtype=jnp.float32)
    obs_rew2 = jax.random.normal(k_r2, (B2, 1), dtype=jnp.float32)
    out2 = jax.block_until_ready(
        weight_network_forward(x2, obs_rew2, weight, bias, block_b=128))
    assert out2.shape == (B2, 1)
    assert jnp.allclose(out2, ref_forward(x2, obs_rew2), rtol=1e-5, atol=1e-6)

    # 3) Multi-block + in-kernel strip loop (tb=4096 -> 2 chunks) + ragged tail.
    B3 = 9000
    x3 = jax.random.normal(k_x3, (B3, data_dim), dtype=jnp.float32)
    obs_rew3 = jax.random.normal(k_r3, (B3, 1), dtype=jnp.float32)
    out3 = jax.block_until_ready(
        weight_network_forward(x3, obs_rew3, weight, bias, block_b=4096))
    assert out3.shape == (B3, 1)
    assert jnp.allclose(out3, ref_forward(x3, obs_rew3), rtol=1e-5, atol=1e-6)

    print("KERNEL_OK")
</pallas_src>

<mosaic_0001>
module attributes {stable_mosaic.version = 11 : i64} {
  func.func @_weightnet_kernel(%arg0: i32, %arg1: memref<8x7xf32, #tpu.memory_space<vmem>>, %arg2: memref<8x1xf32, #tpu.memory_space<vmem>>, %arg3: memref<1x7xf32, #tpu.memory_space<vmem>>, %arg4: memref<2xf32, #tpu.memory_space<smem>>, %arg5: memref<8x1xf32, #tpu.memory_space<vmem>>) attributes {dimension_semantics = [#tpu.dimension_semantics<parallel>], iteration_bounds = array<i64: 1>, scalar_prefetch = 0 : i64, scratch_operands = 0 : i64, tpu.core_type = #tpu.core_type<tc>, window_params = [{transform_indices = @transform_0, window_bounds = array<i64: 8, 7>}, {transform_indices = @transform_1, window_bounds = array<i64: 8, 1>}, {pipeline_mode = #tpu.pipeline_mode<synchronous>, transform_indices = @transform_2, window_bounds = array<i64: 1, 7>}, {transform_indices = @transform_3, window_bounds = array<i64: 2>}, {transform_indices = @transform_4, window_bounds = array<i64: 8, 1>}]} {
    %c0 = arith.constant 0 : index
    %c0_0 = arith.constant 0 : index
    %0 = vector.load %arg3[%c0, %c0_0] : memref<1x7xf32, #tpu.memory_space<vmem>>, vector<1x7xf32>
    %c0_1 = arith.constant 0 : index
    %1 = memref.load %arg4[%c0_1] : memref<2xf32, #tpu.memory_space<smem>>
    %c1 = arith.constant 1 : index
    %2 = memref.load %arg4[%c1] : memref<2xf32, #tpu.memory_space<smem>>
    %c0_2 = arith.constant 0 : index
    %c0_3 = arith.constant 0 : index
    %3 = vector.load %arg1[%c0_2, %c0_3] : memref<8x7xf32, #tpu.memory_space<vmem>>, vector<8x7xf32>
    %4 = vector.broadcast %0 : vector<1x7xf32> to vector<8x7xf32>
    %5 = arith.mulf %3, %4 : vector<8x7xf32>
    %cst = arith.constant dense<0.000000e+00> : vector<8xf32>
    %6 = vector.multi_reduction <add>, %5, %cst [1] : vector<8x7xf32> to vector<8xf32>
    %7 = vector.shape_cast %6 : vector<8xf32> to vector<8x1xf32>
    %c0_4 = arith.constant 0 : index
    %c0_5 = arith.constant 0 : index
    %8 = vector.load %arg2[%c0_4, %c0_5] : memref<8x1xf32, #tpu.memory_space<vmem>>, vector<8x1xf32>
    %9 = vector.broadcast %1 : f32 to vector<8x1xf32>
    %10 = arith.mulf %8, %9 : vector<8x1xf32>
    %11 = arith.addf %7, %10 : vector<8x1xf32>
    %12 = vector.broadcast %2 : f32 to vector<8x1xf32>
    %13 = arith.addf %11, %12 : vector<8x1xf32>
    %14 = math.exp %13 : vector<8x1xf32>
    %c0_6 = arith.constant 0 : index
    %c0_7 = arith.constant 0 : index
    %15 = vector.load %arg5[%c0_6, %c0_7] : memref<8x1xf32, #tpu.memory_space<vmem>>, vector<8x1xf32>
    tpu.vector_store %arg5[%c0_6, %c0_7], %14 {strides = array<i32>} : memref<8x1xf32, #tpu.memory_space<vmem>>, vector<8x1xf32>,
    return
  }
  func.func @transform_0(%arg0: i32) -> (i32, i32) {
    %c0_i32 = arith.constant 0 : i32
    %c0_i32_0 = arith.constant 0 : i32
    return %arg0, %c0_i32 : i32, i32
  }
  func.func @transform_1(%arg0: i32) -> (i32, i32) {
    %c0_i32 = arith.constant 0 : i32
    %c0_i32_0 = arith.constant 0 : i32
    return %arg0, %c0_i32 : i32, i32
  }
  func.func @transform_2(%arg0: i32) -> (i32, i32) {
    %c0_i32 = arith.constant 0 : i32
    %c0_i32_0 = arith.constant 0 : i32
    %c0_i32_1 = arith.constant 0 : i32
    return %c0_i32, %c0_i32_0 : i32, i32
  }
  func.func @transform_3(%arg0: i32) -> i32 {
    %c0_i32 = arith.constant 0 : i32
    %c0_i32_0 = arith.constant 0 : i32
    return %c0_i32 : i32
  }
  func.func @transform_4(%arg0: i32) -> (i32, i32) {
    %c0_i32 = arith.constant 0 : i32
    %c0_i32_0 = arith.constant 0 : i32
    return %arg0, %c0_i32 : i32, i32
  }
}

</mosaic_0001>

<bundles_post_ra>
// kernel: _forward.1
= control target key start
LH: loop header
LB: loop body
LE: loop exit
PB: predicated region body
PF: predicated region fallthrough
CT: control target
= control target key end

     0   :  { %9 = vsyncpa [#allocation3], 0  ;;  %s120_s0 = inlined_call_operand.vmem [shape: f32[8,7], index: 0, kind: input, shape index: {}]   ;;  %s121_s1 = inlined_call_operand.vmem [shape: f32[8,1], index: 1, kind: input, shape index: {}]   ;;  %s122_s2 = inlined_call_operand.vmem [shape: f32[1,7], index: 2, kind: input, shape index: {}]   ;;  %s123_s3 = inlined_call_operand.vmem [shape: f32[2], index: 3, kind: input, shape index: {}]   ;;  %s124_s4 = inlined_call_operand.vmem [shape: f32[8,1], index: 4, kind: output, shape index: {}]  }
   0x1   :  { %s22_s17 = sshll.u32 %s123_s3, 4  ;;  %s23_s17 = int_to_ptr.vmem [resolvable:$true] %s22_s17 }
   0x2   :  { %s65_s18 = scalar_lea.vmem %s23_s17, 16  ;;  %p70_p1 = scmp.lt.s32.totalorder %s23_s17, %s23_s17 }
   0x3   :  { %p66_p0 = scmp.ne.s32.totalorder %s23_s17, %s65_s18  ;;  %p71_p2 = scmp.lt.s32.totalorder %s65_s18, %s65_s18 }
   0x5   :  { %p72_p3 = por %p71_p2, %p70_p1 }
   0x7   :  { %p73_p4 = pnand %p72_p3, %p66_p0 }
   0x9   :  { %76 = shalt.err (!%p73_p4)
}
   0xa   :  { %s79_s19 = smov [#allocation2]  }
   0xb   :  { %25 = dma.vmem_to_smem %s23_s17, 16, %s79_s19, [#allocation3]  }
   0xc   :  { %77 = dma.done.wait [#allocation3], 16  }
   0xd   :  { %78 = vsyncadd [#allocation3], 4294967280 }
   0xe   :  { %29 = sfence }
   0xf   :  { %v61_v0 = vld [vmem:[%s122_s2] ss:$0 sm:$0xff]  ;;  %vm41_vm0 = vcmask 56320   ;;  %s31_s3 = sld [smem:[#allocation2]]  ;;  %vm53_vm1 = vcmask 7168  }
  0x10   :  { %v33_v1 = vld [vmem:[%s120_s0] sm:$0xff]  ;;  %s60_s24 = sld [smem:[#allocation2 + $0x1]] }
  0x11   :  { %v40_v2 = vmul.f32 %v61_v0, %v33_v1  ;;  %v45_v4 = vld [vmem:[%s121_s1] sm:$0xff] }
  0x13   :  { %v42_v3 = vsel %vm41_vm0, %v40_v2, 0.0 }
  0x14   :  { %43 = vadd.xlane.f32.xlu0 %v42_v3 }
  0x15   :  { %v46_v5 = vstv %s31_s3 }
  0x16   :  { %v47_v6 = vmul.f32 %v46_v5, %v45_v4  ;;  %v49_v8 = vstv %s60_s24 }
  0x9d   :  { %v44_v7 = vpop.xlane.xlu0 %43 }
  0x9e   :  { %v48_v9 = vadd.f32 %v47_v6, %v44_v7 }
  0xa0   :  { %v50_v10 = vadd.f32 %v49_v8, %v48_v9 }
  0xa2   :  { %v51_v11 = vmul.f32 1.442695, %v50_v10 }
  0xa4   :  { %63 = vpow2.f32 %v51_v11 }
  0xb1   :  { %v64_v12 = vpop.eup %63 }
  0xb2   :  { %54 = vst.msk [vmem:[%s124_s4] sm:$0xff] %vm53_vm1, %v64_v12 }
  0xb3   :  { %59 = vsyncpa [#allocation3], 1 }

</bundles_post_ra>
